<compile_context>
chip_gen: v5e
topology: v5e:2x2
jax: 0.10.0
libtpu: 0.0.40
codegen_flags: <defaults>
</compile_context>

<pallas_src>
import jax
import jax.numpy as jnp
from jax import lax
from jax.experimental import pallas as pl
from jax.experimental.pallas import tpu as pltpu


def _round_up(x, m):
    return ((x + m - 1) // m) * m


def _vmem_capacity_bytes():
    """Physical VMEM of the current generation (conservative fallback)."""
    try:
        return int(pltpu.get_tpu_info().vmem_capacity_bytes)
    except Exception:
        return 64 << 20  # v7x has the smallest VMEM (64 MiB); safe everywhere


def _acu_affine_kernel(x_ref, w_ref, b_ref, o_ref):
    """Folded-affine forward on one batch tile.

    x_ref: (tile, D)  VMEM — batch on sublanes, features on lanes
    w_ref: (8, D)     VMEM — folded weight in row 0, rows 1..7 zero padding
    b_ref: (1,)       SMEM — folded bias scalar
    o_ref: (1, tile)  VMEM — batch on lanes -> lane-dense (unmasked) stores
    """
    # Contract the feature (lane) axis of both operands: (8, D) . (tile, D)^T
    # -> (8, tile).  Standard trans-B matmul on the MXU; result lands directly
    # lane-dense (batch on lanes).  precision=HIGHEST is free (DMA-bound) and
    # matches the HIGHEST-precision fold/reference path.
    y = lax.dot_general(
        w_ref[...],
        x_ref[...],
        dimension_numbers=(((1,), (1,)), ((), ())),
        preferred_element_type=jnp.float32,
        precision=lax.Precision.HIGHEST,
    )
    # Row 0 holds the real result (other rows come from zero-padded weight
    # rows).  Bias is a scalar read from SMEM, broadcast along the lane axis.
    o_ref[...] = (y[0:1, :] + b_ref[0]).astype(o_ref.dtype)


def fold_acu_params(params):
    """Collapse the 5 Linear layers into one affine map (exact at eval time).

    Returns:
      w_pad: (8, D) f32 — folded weight (W1@W2@W3@W4@W5)^T in row 0, zeros below.
      b:     (1,)   f32 — folded bias.
    """
    hp = lax.Precision.HIGHEST
    (w, b) = params[0]
    for wi, bi in params[1:]:
        w = jnp.dot(w, wi, precision=hp)           # (D, k) @ (k, k') -> (D, k')
        b = jnp.dot(b, wi, precision=hp) + bi      # (1, k) @ (k, k') + (1, k')
    # w: (D, 1), b: (1, 1)
    w_row = w.T                                    # (1, D)
    w_pad = jnp.concatenate(
        [w_row, jnp.zeros((7, w_row.shape[1]), w_row.dtype)], axis=0
    )                                              # (8, D) sublane-aligned MXU lhs
    return w_pad, b.reshape(1)


def acu_forward(x, w_pad, b, *, batch_tile=None):
    """x: (B, D) f32 or bf16.  w_pad: (8, D) f32.  b: (1,) f32.  Returns (B, 1) f32."""
    B, D = x.shape
    assert w_pad.shape == (8, D), w_pad.shape
    assert b.shape == (1,), b.shape

    # Stream x in its native dtype (bf16 halves HBM bytes; MXU is bf16-native).
    w = w_pad.astype(x.dtype)
    itemsize = jnp.dtype(x.dtype).itemsize

    # ---------- VMEM-aware, generation-aware tile sizing ----------
    D_pad = _round_up(D, 128)                      # lane padding of x/w VMEM tiles
    physical = _vmem_capacity_bytes()              # 64 MiB (v7x) / 128 MiB (v5e/v6e)
    target_budget = physical // 2                  # scoped request: 32 / 64 MiB
    # Per-row VMEM cost of ONE pipelined x buffer plus its share of the output
    # buffer (the (1, tile) out block pads to 8 f32 sublanes).
    per_row = D_pad * itemsize + 8 * 4
    weight_bytes = 2 * 8 * D_pad * itemsize        # resident weight, double-buffered
    x_budget = max(0, int(0.8 * target_budget) - weight_bytes)
    max_rows = (x_budget // (2 * per_row)) // 128 * 128
    if max_rows < 128:
        max_rows = 128                             # floor; vmem_limit raised below

    if batch_tile is None:
        tile = max_rows                            # cap-driven: amortize per-step cost
    else:
        tile = min(max(128, (batch_tile // 128) * 128), max_rows)

    if B <= tile:
        if B >= 256:
            # Keep >= 2 grid steps so the "parallel" batch axis can shard across
            # both TensorCores on v7x (one extra ~0.35us step elsewhere: noise).
            tile = _round_up(pl.cdiv(B, 2), 128)
        else:
            tile = B                               # single full block (exact dims)

    grid = (pl.cdiv(B, tile),)

    # Scoped-VMEM request: generation target, bumped if the tile floor needs it.
    needed = 2 * tile * per_row + weight_bytes + (1 << 20)
    vmem_limit = int(min(int(0.9 * physical), max(target_budget, needed)))

    cost = pl.CostEstimate(
        flops=2 * B * D,
        transcendentals=0,
        bytes_accessed=B * D * itemsize + 8 * D * itemsize + B * 4 + 4,
    )

    out = pl.pallas_call(
        _acu_affine_kernel,
        out_shape=jax.ShapeDtypeStruct((1, B), jnp.float32),
        grid_spec=pltpu.PrefetchScalarGridSpec(
            num_scalar_prefetch=0,
            grid=grid,
            in_specs=[
                pl.BlockSpec((tile, D), lambda i: (i, 0)),   # x batch tile
                pl.BlockSpec((8, D), lambda i: (0, 0)),      # folded weight (resident)
                pl.BlockSpec(memory_space=pltpu.MemorySpace.SMEM),  # bias scalar
            ],
            out_specs=pl.BlockSpec((1, tile), lambda i: (0, i)),
        ),
        compiler_params=pltpu.CompilerParams(
            dimension_semantics=("parallel",),
            vmem_limit_bytes=vmem_limit,
        ),
        cost_estimate=cost,
    )(x, w, b)
    # (1, B) lane-major slab -> (B, 1) to match the module's output shape.
    # (Consumers that can take the slab directly should, to skip this relayout.)
    return out.reshape(B, 1)


def init_params(key, input_size):
    """Deterministic synthetic parameters; weights stored as (in, out)."""
    dims = [input_size, 1024, 128, 64, 16, 1]
    params = []
    for li, (din, dout) in enumerate(zip(dims[:-1], dims[1:])):
        kw, kb = jax.random.split(jax.random.fold_in(key, li))
        bound = 1.0 / jnp.sqrt(jnp.float32(din))  # PyTorch Linear default init range
        w = jax.random.uniform(kw, (din, dout), jnp.float32, -bound, bound)
        b = jax.random.uniform(kb, (1, dout), jnp.float32, -bound, bound)
        params.append((w, b))
    return params


def acu_reference(x, params):
    """Plain-JAX layer-by-layer reference (eval mode: dropout is identity)."""
    hp = lax.Precision.HIGHEST
    h = x
    for w, b in params:
        h = jnp.dot(h, w, precision=hp) + b
    return h


if __name__ == "__main__":
    key = jax.random.PRNGKey(0)
    batch, input_size = 8, 32

    kx, kp, kx2 = jax.random.split(key, 3)
    x = jax.random.normal(kx, (batch, input_size), jnp.float32)
    params = init_params(kp, input_size)
    w_pad, b_fold = fold_acu_params(params)

    # Small-batch path: single full block.
    out = jax.block_until_ready(acu_forward(x, w_pad, b_fold))
    ref = acu_reference(x, params)
    assert out.shape == (batch, 1), out.shape
    assert jnp.allclose(out, ref, atol=2e-4, rtol=2e-4), (
        float(jnp.max(jnp.abs(out - ref)))
    )

    # Larger batch, default (cap-driven) tile: exercises the >=2-grid-step split.
    batch2 = 300
    x2 = jax.random.normal(kx2, (batch2, input_size), jnp.float32)
    out2 = jax.block_until_ready(acu_forward(x2, w_pad, b_fold))
    ref2 = acu_reference(x2, params)
    assert out2.shape == (batch2, 1), out2.shape
    assert jnp.allclose(out2, ref2, atol=2e-4, rtol=2e-4), (
        float(jnp.max(jnp.abs(out2 - ref2)))
    )

    # Explicit small tile: multi-step grid with a padded last x block and a
    # clipped lane-dense output write.
    out3 = jax.block_until_ready(acu_forward(x2, w_pad, b_fold, batch_tile=128))
    assert out3.shape == (batch2, 1), out3.shape
    assert jnp.allclose(out3, ref2, atol=2e-4, rtol=2e-4), (
        float(jnp.max(jnp.abs(out3 - ref2)))
    )

    # bf16 streaming path (halves HBM bytes for x); reference does the same
    # bf16 multiply with f32 accumulation.
    x_bf = x2.astype(jnp.bfloat16)
    out_bf = jax.block_until_ready(acu_forward(x_bf, w_pad, b_fold))
    ref_bf = (
        jnp.dot(x_bf, w_pad.astype(jnp.bfloat16).T,
                preferred_element_type=jnp.float32)[:, 0:1]
        + b_fold[0]
    )
    assert out_bf.shape == (batch2, 1), out_bf.shape
    assert jnp.allclose(out_bf, ref_bf, atol=1e-2, rtol=1e-2), (
        float(jnp.max(jnp.abs(out_bf - ref_bf)))
    )

    print("KERNEL_OK")
</pallas_src>

<mosaic_0001>
module attributes {stable_mosaic.version = 11 : i64} {
  func.func @_acu_affine_kernel(%arg0: i32, %arg1: memref<8x32xf32, #tpu.memory_space<vmem>>, %arg2: memref<8x32xf32, #tpu.memory_space<vmem>>, %arg3: memref<1xf32, #tpu.memory_space<smem>>, %arg4: memref<1x8xf32, #tpu.memory_space<vmem>>) attributes {dimension_semantics = [#tpu.dimension_semantics<parallel>], iteration_bounds = array<i64: 1>, scalar_prefetch = 0 : i64, scratch_operands = 0 : i64, tpu.core_type = #tpu.core_type<tc>, window_params = [{transform_indices = @transform_0, window_bounds = array<i64: 8, 32>}, {pipeline_mode = #tpu.pipeline_mode<synchronous>, transform_indices = @transform_1, window_bounds = array<i64: 8, 32>}, {transform_indices = @transform_2, window_bounds = array<i64: 1>}, {transform_indices = @transform_3, window_bounds = array<i64: 1, 8>}]} {
    %c0 = arith.constant 0 : index
    %c0_0 = arith.constant 0 : index
    %0 = vector.load %arg2[%c0, %c0_0] : memref<8x32xf32, #tpu.memory_space<vmem>>, vector<8x32xf32>
    %c0_1 = arith.constant 0 : index
    %c0_2 = arith.constant 0 : index
    %1 = vector.load %arg1[%c0_1, %c0_2] : memref<8x32xf32, #tpu.memory_space<vmem>>, vector<8x32xf32>
    %cst = arith.constant dense<0.000000e+00> : vector<8x8xf32>
    %2 = tpu.matmul %0, %1, %cst {dimension_numbers = #tpu.dot_dimension_numbers<[1], [1], [0], [0], [0, 0, 1, 0], [], []>, precision = #tpu.contract_precision<fp32>} : vector<8x32xf32>, vector<8x32xf32>, vector<8x8xf32> -> vector<8x8xf32>
    %3 = vector.extract_strided_slice %2 {offsets = [0, 0], sizes = [1, 8], strides = [1, 1]} : vector<8x8xf32> to vector<1x8xf32>
    %c0_3 = arith.constant 0 : index
    %4 = memref.load %arg3[%c0_3] : memref<1xf32, #tpu.memory_space<smem>>
    %5 = vector.broadcast %4 : f32 to vector<1x8xf32>
    %6 = arith.addf %3, %5 : vector<1x8xf32>
    %c0_4 = arith.constant 0 : index
    %c0_5 = arith.constant 0 : index
    %7 = vector.load %arg4[%c0_4, %c0_5] : memref<1x8xf32, #tpu.memory_space<vmem>>, vector<1x8xf32>
    tpu.vector_store %arg4[%c0_4, %c0_5], %6 {strides = array<i32>} : memref<1x8xf32, #tpu.memory_space<vmem>>, vector<1x8xf32>,
    return
  }
  func.func @transform_0(%arg0: i32) -> (i32, i32) {
    %c0_i32 = arith.constant 0 : i32
    %c0_i32_0 = arith.constant 0 : i32
    return %arg0, %c0_i32 : i32, i32
  }
  func.func @transform_1(%arg0: i32) -> (i32, i32) {
    %c0_i32 = arith.constant 0 : i32
    %c0_i32_0 = arith.constant 0 : i32
    %c0_i32_1 = arith.constant 0 : i32
    return %c0_i32, %c0_i32_0 : i32, i32
  }
  func.func @transform_2(%arg0: i32) -> i32 {
    %c0_i32 = arith.constant 0 : i32
    %c0_i32_0 = arith.constant 0 : i32
    return %c0_i32 : i32
  }
  func.func @transform_3(%arg0: i32) -> (i32, i32) {
    %c0_i32 = arith.constant 0 : i32
    %c0_i32_0 = arith.constant 0 : i32
    return %c0_i32, %arg0 : i32, i32
  }
}

</mosaic_0001>

<bundles_post_ra>
// kernel: tpu_custom_call.1
= control target key start
LH: loop header
LB: loop body
LE: loop exit
PB: predicated region body
PF: predicated region fallthrough
CT: control target
= control target key end

     0   :  { %9 = vsyncpa [#allocation4], 0  ;;  %s338_s0 = inlined_call_operand.hbm [shape: f32[8,32], index: 0, kind: input, shape index: {}]   ;;  %s339_s1 = inlined_call_operand.hbm [shape: f32[8,32], index: 1, kind: input, shape index: {}]   ;;  %s340_s2 = inlined_call_operand.<no memory space> [shape: f32[1], index: 2, kind: input, shape index: {}]   ;;  %s341_s3 = inlined_call_operand.hbm [shape: f32[1,8], index: 3, kind: output, shape index: {}]  }
   0x1   :  { %10 = vsyncpa [#allocation7], 0 }
   0x2   :  { %11 = vsyncpa [#allocation5], 0  ;;  %s17_s14 = sshll.u32 %s338_s0, 4  ;;  %s303_s15 = smov [#allocation3]   ;;  %s18_s14 = int_to_ptr.hbm [resolvable:$true] %s17_s14 }
   0x3   :  { %s19_s16 = sshll.u32 %s303_s15, 4  ;;  %s28_s19 = sshll.u32 %s339_s1, 4  ;;  %s20_s16 = int_to_ptr.vmem [resolvable:$true] %s19_s16  ;;  %s29_s19 = int_to_ptr.hbm [resolvable:$true] %s28_s19 }
   0x4   :  { %22 = dma.hbm_to_vmem [thread:$0]  %s18_s14, 128, %s20_s16, [#allocation4]  }
   0x5   :  { %s304_s20 = smov [#allocation6]  }
   0x6   :  { %s30_s21 = sshll.u32 %s304_s20, 4  ;;  %s31_s21 = int_to_ptr.vmem [resolvable:$true] %s30_s21 }
   0x7   :  { %33 = dma.hbm_to_vmem [thread:$0]  %s29_s19, 128, %s31_s21, [#allocation7]  }
   0x8   :  { %297 = dma.done.wait [#allocation4], 128  }
   0x9   :  { %298 = vsyncadd [#allocation4], 4294967168 }
   0xa   :  { %299 = dma.done.wait [#allocation7], 128  }
   0xb   :  { %300 = vsyncadd [#allocation7], 4294967168  ;;  %vm46_vm0 = vcmask 261120   ;;  %v45_v0 = vld [vmem:[#allocation3] sm:$0xff]  ;;  %v44_v1 = vld [vmem:[#allocation6] sm:$0xff]  ;;  %v200_v24 = vstv %s340_s2  ;;  %s305_s22 = smov [#allocation8]  }
   0xc   :  { %v51_v2 = vsel %vm46_vm0, %v45_v0, 0  ;;  %v48_v3 = vsel %vm46_vm0, %v44_v1, 0  ;;  %s209_s23 = sshll.u32 %s305_s22, 4  ;;  %s211_s26 = sshll.u32 %s341_s3, 4  ;;  %vm202_vm1 = vcmask 57344   ;;  %s210_s23 = int_to_ptr.vmem [resolvable:$true] %s209_s23  ;;  %s212_s26 = int_to_ptr.hbm [resolvable:$true] %s211_s26 }
   0xd   :  { %v68_v4 = vand.u32 4294901760, %v51_v2  ;;  %v70_v5 = vand.u32 4294901760, %v48_v3 }
   0xf   :  { %v95_v6 = vsub.f32 %v51_v2, %v68_v4  ;;  %69 = vmatpush.xpose.msra.mxu0 %v68_v4  ;;  %145 = vmatpush.xpose.msra.mxu3 %v68_v4  ;;  %v71_v7 = vsub.f32 %v48_v3, %v70_v5 }
  0x11   :  { %122 = vmatpush.xpose.msra.mxu2 %v95_v6  ;;  %v96_v8 = vand.u32 4294901760, %v95_v6  ;;  %v72_v9 = vand.u32 4294901760, %v71_v7 }
  0x13   :  { %v97_v10 = vsub.f32 %v95_v6, %v96_v8  ;;  %v73_v11 = vsub.f32 %v71_v7, %v72_v9  ;;  %149 = vmatmul.f32.vlgmr.msra.gmra.mxu3 %v72_v9  ;;  %171 = vmatpush.xpose.msrb.mxu0 %v96_v8 }
  0x14   :  { %125 = vmatmul.f32.vlgmr.msra.gmra.mxu2 %v71_v7 }
  0x15   :  { %v98_v12 = vand.u32 4294901760, %v97_v10  ;;  %v74_v13 = vand.u32 4294901760, %v73_v11 }
  0x17   :  { %99 = vmatpush.xpose.msra.mxu1 %v98_v12  ;;  %75 = vmatmul.f32.vlgmr.msra.gmra.mxu0 %v74_v13 }
  0x1a   :  { %101 = vmatmul.f32.vlgmr.msra.gmra.mxu1 %v70_v5 }
  0x1b   :  { %193 = vmatpush.xpose.msrb.mxu1 %v68_v4 }
  0x1f   :  { %173 = vmatmul.f32.vlgmr.msrb.gmra.mxu0 %v70_v5 }
  0x22   :  { %195 = vmatmul.f32.vlgmr.msrb.gmra.mxu1 %v70_v5 }
  0x94   :  { %v76_v14 = vpop.f32.mrf.mxu0 }
  0x96   :  { %v150_v18 = vpop.f32.mrf.mxu3 }
  0x97   :  { %v102_v15 = vpop.f32.mrf.mxu1  ;;  %v126_v16 = vpop.f32.mrf.mxu2 }
  0x98   :  { %v103_v17 = vadd.f32 %v102_v15, %v76_v14 }
  0x9a   :  { %v127_v19 = vadd.f32 %v126_v16, %v103_v17 }
  0x9c   :  { %v151_v20 = vadd.f32 %v150_v18, %v127_v19  ;;  %v174_v21 = vpop.f32.mrf.mxu0 }
  0x9e   :  { %v175_v22 = vadd.f32 %v174_v21, %v151_v20 }
  0x9f   :  { %v196_v23 = vpop.f32.mrf.mxu1 }
  0xa0   :  { %v197_v25 = vadd.f32 %v196_v23, %v175_v22 }
  0xa2   :  { %v201_v26 = vadd.f32 %v200_v24, %v197_v25 }
  0xa4   :  { %203 = vst.msk [vmem:[#allocation8] sm:$0x1] %vm202_vm1, %v201_v26 }
  0xa5   :  { %214 = dma.vmem_to_hbm [thread:$0]  %s210_s23, 16, %s212_s26, [#allocation5]  }
  0xa6   :  { %301 = dma.done.wait [#allocation5], 16  }
  0xa7   :  { %302 = vsyncadd [#allocation5], 4294967280 }
  0xa8   :  { %219 = vsyncpa [#allocation4], 1 }
  0xa9   :  { %220 = vsyncpa [#allocation7], 1 }
  0xaa   :  { %221 = vsyncpa [#allocation5], 1 }

</bundles_post_ra>
